<compile_context>
chip_gen: v5e
topology: v5e:2x2
jax: 0.10.0
libtpu: 0.0.40
codegen_flags: <defaults>
</compile_context>

<pallas_src>
import math
from functools import partial

import jax
import jax.numpy as jnp
from jax import lax
from jax.experimental import pallas as pl
from jax.experimental.pallas import tpu as pltpu

HID1 = 128
HID2 = 64
HID2P = 128          # hidden-2 padded to a full lane width
LANE = 128
MAX_ROW_TILE = 2048  # 256-aligned M tiles; fewer ~0.35us grid steps
NEG_INF = -1e30      # f32 bias fill for padded action columns -> softmax prob 0
                     # (use jnp.finfo(dtype).min/2 if logits ever go bf16)
VMEM_LIMIT_BYTES = 32 * 1024 * 1024   # explicit: portable across v5e/v6e/v7x


def _gelu_exact(x):
    # PyTorch nn.GELU() default: exact erf-based GELU (kept for 1e-5 parity).
    return 0.5 * x * (1.0 + lax.erf(x * (1.0 / math.sqrt(2.0))))


def _round_up(x, m):
    return ((x + m - 1) // m) * m


def _choose_row_tile(B, D, AP):
    """Pick the batch row tile.

    Small B (latency-bound actor path): one sublane-aligned step.
    Large B: 256-aligned tile capped at ~cdiv(B, 2) so the 'parallel' grid has
    >= 2 steps (v7x megacore sharding) and at MAX_ROW_TILE, with a rough
    VMEM-budget cap so double-buffered x/out tiles + f32 temporaries stay
    comfortably under the 32 MiB scoped limit.
    """
    if B <= 256:
        return _round_up(B, 8)
    tile = min(MAX_ROW_TILE, _round_up(pl.cdiv(B, 2), 256))
    # bytes/row: x (x2 buf) + out (x2 buf) + h1/h2 f32 temporaries
    per_row = 4 * (2 * D + 2 * AP + 2 * HID1 + HID2P)
    while tile > 256 and tile * per_row > (24 << 20):
        tile -= 256
    return tile


def mlp_policy_kernel(x_ref, w1_ref, b1_ref, w2_ref, b2_ref, w3_ref, b3_ref, o_ref):
    x = x_ref[...]

    h1 = jnp.dot(x, w1_ref[...], preferred_element_type=jnp.float32) + b1_ref[...]
    h1 = _gelu_exact(h1)

    h2 = jnp.dot(h1, w2_ref[...], preferred_element_type=jnp.float32) + b2_ref[...]
    h2 = _gelu_exact(h2)

    logits = jnp.dot(h2, w3_ref[...], preferred_element_type=jnp.float32) + b3_ref[...]

    # numerically stabilized softmax over the (lane-dense, padded) action dim;
    # padded columns carry logit ~ -1e30 -> exp == 0 -> no probability leak.
    m = jnp.max(logits, axis=-1, keepdims=True)
    e = jnp.exp(logits - m)
    denom = jnp.sum(e, axis=-1, keepdims=True)
    o_ref[...] = (e * pl.reciprocal(denom, approx=False)).astype(o_ref.dtype)


def prepare_params(w1, b1, w2, b2, w3, b3):
    """One-time lane-dense padding of the tiny weights (hoisted out of the
    per-call forward):
      * W2 cols / b2 zero-padded 64 -> 128 (GELU(0) == 0 -> padded h2 cols are 0)
      * W3 rows zero-padded 64 -> 128 (padded h2 cols contribute nothing)
      * W3 cols zero-padded / b3 padded with -1e30 so fake actions get prob 0
    """
    A = w3.shape[1]
    AP = max(LANE, _round_up(A, LANE))
    w2p = jnp.pad(w2, ((0, 0), (0, HID2P - HID2)))
    b2p = jnp.pad(b2, ((0, 0), (0, HID2P - HID2)))
    w3p = jnp.pad(w3, ((0, HID2P - HID2), (0, AP - A)))
    b3p = jnp.pad(b3, ((0, 0), (0, AP - A)), constant_values=NEG_INF)
    return (jnp.asarray(w1, jnp.float32), jnp.asarray(b1, jnp.float32),
            w2p.astype(jnp.float32), b2p.astype(jnp.float32),
            w3p.astype(jnp.float32), b3p.astype(jnp.float32))


@partial(jax.jit, static_argnames=("num_actions",))
def mlp_policy_forward(x, w1, b1, w2p, b2p, w3p, b3p, *, num_actions):
    x = x.astype(jnp.float32)
    B, D = x.shape
    AP = w3p.shape[1]

    row_tile = _choose_row_tile(B, D, AP)
    grid = (pl.cdiv(B, row_tile),)

    out = pl.pallas_call(
        mlp_policy_kernel,
        out_shape=jax.ShapeDtypeStruct((B, AP), jnp.float32),
        grid_spec=pltpu.PrefetchScalarGridSpec(
            num_scalar_prefetch=0,
            grid=grid,
            in_specs=[
                pl.BlockSpec((row_tile, D), lambda i: (i, 0)),   # x rows
                # Constant-index weights/biases: DMA'd once, resident in VMEM.
                # (pipeline_mode=pl.Buffered(1) would drop the unused second
                # buffer, ~260 KB; default double-buffering accepted since
                # VMEM headroom is ample at these tile sizes.)
                pl.BlockSpec((D, HID1), lambda i: (0, 0)),       # W1 (in, out)
                pl.BlockSpec((1, HID1), lambda i: (0, 0)),       # b1
                pl.BlockSpec((HID1, HID2P), lambda i: (0, 0)),   # W2 (padded)
                pl.BlockSpec((1, HID2P), lambda i: (0, 0)),      # b2 (padded)
                pl.BlockSpec((HID2P, AP), lambda i: (0, 0)),     # W3 (padded)
                pl.BlockSpec((1, AP), lambda i: (0, 0)),         # b3 (padded)
            ],
            out_specs=pl.BlockSpec((row_tile, AP), lambda i: (i, 0)),
        ),
        compiler_params=pltpu.CompilerParams(
            dimension_semantics=("parallel",),
            vmem_limit_bytes=VMEM_LIMIT_BYTES),
    )(x, w1, b1, w2p, b2p, w3p, b3p)

    # TODO(synk): downstream callers that can consume the padded (B, AP) probs
    # directly (or fuse sampling / log-prob) should skip this slice; it costs
    # an extra HBM pass that matters most on v5e.
    return out[:, :num_actions]


def init_params(key, obs_input_dim, num_actions):
    """Deterministic init matching the PyTorch module's reset_parameters():
       xavier_uniform_ weights, default uniform(-1/sqrt(fan_in), ...) biases."""
    ks = jax.random.split(key, 6)

    def xavier(k, fan_in, fan_out):
        bound = math.sqrt(6.0 / (fan_in + fan_out))
        # stored transposed: (in, out)
        return jax.random.uniform(k, (fan_in, fan_out), jnp.float32, -bound, bound)

    def bias(k, fan_in, fan_out):
        bound = 1.0 / math.sqrt(fan_in)
        return jax.random.uniform(k, (1, fan_out), jnp.float32, -bound, bound)

    w1 = xavier(ks[0], obs_input_dim, HID1)
    b1 = bias(ks[1], obs_input_dim, HID1)
    w2 = xavier(ks[2], HID1, HID2)
    b2 = bias(ks[3], HID1, HID2)
    w3 = xavier(ks[4], HID2, num_actions)
    b3 = bias(ks[5], HID2, num_actions)
    return w1, b1, w2, b2, w3, b3


def _reference(x, w1, b1, w2, b2, w3, b3):
    h1 = _gelu_exact(x @ w1 + b1)
    h2 = _gelu_exact(h1 @ w2 + b2)
    return jax.nn.softmax(h2 @ w3 + b3, axis=-1)


if __name__ == "__main__":
    obs_input_dim = 32
    num_actions = 5
    num_agents = 3
    batch = 2

    key = jax.random.PRNGKey(0)
    k_obs, k_par, k_big = jax.random.split(key, 3)

    raw_params = init_params(k_par, obs_input_dim, num_actions)
    params = prepare_params(*raw_params)   # one-time padded weights

    # --- small latency-bound actor batch: [batch, num_agents, obs_dim] ---
    obs = jax.random.normal(k_obs, (batch, num_agents, obs_input_dim), jnp.float32)
    x = obs.reshape(batch * num_agents, obs_input_dim)
    probs = jax.block_until_ready(
        mlp_policy_forward(x, *params, num_actions=num_actions))
    ref = _reference(x, *raw_params)
    assert probs.shape == (batch * num_agents, num_actions)
    assert jnp.allclose(jnp.sum(probs, axis=-1), 1.0, atol=1e-5)
    assert jnp.allclose(probs, ref, atol=1e-5, rtol=1e-5)

    # --- larger training-style batch: exercises the 256-aligned multi-step
    # grid (>= 2 'parallel' steps -> both v7x TCs) and the ragged last block.
    xb = jax.random.normal(k_big, (600, obs_input_dim), jnp.float32)
    probs_b = jax.block_until_ready(
        mlp_policy_forward(xb, *params, num_actions=num_actions))
    ref_b = _reference(xb, *raw_params)
    assert probs_b.shape == (600, num_actions)
    assert jnp.allclose(jnp.sum(probs_b, axis=-1), 1.0, atol=1e-5)
    assert jnp.allclose(probs_b, ref_b, atol=1e-5, rtol=1e-5)

    print("KERNEL_OK")
</pallas_src>

<mosaic_0001>
module attributes {stable_mosaic.version = 11 : i64} {
  func.func @mlp_policy_kernel(%arg0: i32, %arg1: memref<8x32xf32, #tpu.memory_space<vmem>>, %arg2: memref<32x128xf32, #tpu.memory_space<vmem>>, %arg3: memref<1x128xf32, #tpu.memory_space<vmem>>, %arg4: memref<128x128xf32, #tpu.memory_space<vmem>>, %arg5: memref<1x128xf32, #tpu.memory_space<vmem>>, %arg6: memref<128x128xf32, #tpu.memory_space<vmem>>, %arg7: memref<1x128xf32, #tpu.memory_space<vmem>>, %arg8: memref<8x128xf32, #tpu.memory_space<vmem>>) attributes {dimension_semantics = [#tpu.dimension_semantics<parallel>], iteration_bounds = array<i64: 1>, scalar_prefetch = 0 : i64, scratch_operands = 0 : i64, tpu.core_type = #tpu.core_type<tc>, window_params = [{transform_indices = @transform_0, window_bounds = array<i64: 8, 32>}, {pipeline_mode = #tpu.pipeline_mode<synchronous>, transform_indices = @transform_1, window_bounds = array<i64: 32, 128>}, {pipeline_mode = #tpu.pipeline_mode<synchronous>, transform_indices = @transform_2, window_bounds = array<i64: 1, 128>}, {pipeline_mode = #tpu.pipeline_mode<synchronous>, transform_indices = @transform_3, window_bounds = array<i64: 128, 128>}, {pipeline_mode = #tpu.pipeline_mode<synchronous>, transform_indices = @transform_4, window_bounds = array<i64: 1, 128>}, {pipeline_mode = #tpu.pipeline_mode<synchronous>, transform_indices = @transform_5, window_bounds = array<i64: 128, 128>}, {pipeline_mode = #tpu.pipeline_mode<synchronous>, transform_indices = @transform_6, window_bounds = array<i64: 1, 128>}, {transform_indices = @transform_7, window_bounds = array<i64: 8, 128>}]} {
    %c0 = arith.constant 0 : index
    %c0_0 = arith.constant 0 : index
    %0 = vector.load %arg1[%c0, %c0_0] : memref<8x32xf32, #tpu.memory_space<vmem>>, vector<8x32xf32>
    %c0_1 = arith.constant 0 : index
    %c0_2 = arith.constant 0 : index
    %1 = vector.load %arg2[%c0_1, %c0_2] : memref<32x128xf32, #tpu.memory_space<vmem>>, vector<32x128xf32>
    %cst = arith.constant dense<0.000000e+00> : vector<8x128xf32>
    %2 = tpu.matmul %0, %1, %cst {dimension_numbers = #tpu.dot_dimension_numbers<[1], [0], [0], [1], [0, 0, 1, 1], [], []>} : vector<8x32xf32>, vector<32x128xf32>, vector<8x128xf32> -> vector<8x128xf32>
    %c0_3 = arith.constant 0 : index
    %c0_4 = arith.constant 0 : index
    %3 = vector.load %arg3[%c0_3, %c0_4] : memref<1x128xf32, #tpu.memory_space<vmem>>, vector<1x128xf32>
    %4 = vector.broadcast %3 : vector<1x128xf32> to vector<8x128xf32>
    %5 = arith.addf %2, %4 : vector<8x128xf32>
    %cst_5 = arith.constant 5.000000e-01 : f32
    %6 = vector.broadcast %cst_5 : f32 to vector<8x128xf32>
    %7 = arith.mulf %6, %5 : vector<8x128xf32>
    %cst_6 = arith.constant 0.707106769 : f32
    %8 = vector.broadcast %cst_6 : f32 to vector<8x128xf32>
    %9 = arith.mulf %5, %8 : vector<8x128xf32>
    %10 = math.erf %9 : vector<8x128xf32>
    %cst_7 = arith.constant 1.000000e+00 : f32
    %11 = vector.broadcast %cst_7 : f32 to vector<8x128xf32>
    %12 = arith.addf %11, %10 : vector<8x128xf32>
    %13 = arith.mulf %7, %12 : vector<8x128xf32>
    %c0_8 = arith.constant 0 : index
    %c0_9 = arith.constant 0 : index
    %14 = vector.load %arg4[%c0_8, %c0_9] : memref<128x128xf32, #tpu.memory_space<vmem>>, vector<128x128xf32>
    %cst_10 = arith.constant dense<0.000000e+00> : vector<8x128xf32>
    %15 = tpu.matmul %13, %14, %cst_10 {dimension_numbers = #tpu.dot_dimension_numbers<[1], [0], [0], [1], [0, 0, 1, 1], [], []>} : vector<8x128xf32>, vector<128x128xf32>, vector<8x128xf32> -> vector<8x128xf32>
    %c0_11 = arith.constant 0 : index
    %c0_12 = arith.constant 0 : index
    %16 = vector.load %arg5[%c0_11, %c0_12] : memref<1x128xf32, #tpu.memory_space<vmem>>, vector<1x128xf32>
    %17 = vector.broadcast %16 : vector<1x128xf32> to vector<8x128xf32>
    %18 = arith.addf %15, %17 : vector<8x128xf32>
    %cst_13 = arith.constant 5.000000e-01 : f32
    %19 = vector.broadcast %cst_13 : f32 to vector<8x128xf32>
    %20 = arith.mulf %19, %18 : vector<8x128xf32>
    %cst_14 = arith.constant 0.707106769 : f32
    %21 = vector.broadcast %cst_14 : f32 to vector<8x128xf32>
    %22 = arith.mulf %18, %21 : vector<8x128xf32>
    %23 = math.erf %22 : vector<8x128xf32>
    %cst_15 = arith.constant 1.000000e+00 : f32
    %24 = vector.broadcast %cst_15 : f32 to vector<8x128xf32>
    %25 = arith.addf %24, %23 : vector<8x128xf32>
    %26 = arith.mulf %20, %25 : vector<8x128xf32>
    %c0_16 = arith.constant 0 : index
    %c0_17 = arith.constant 0 : index
    %27 = vector.load %arg6[%c0_16, %c0_17] : memref<128x128xf32, #tpu.memory_space<vmem>>, vector<128x128xf32>
    %cst_18 = arith.constant dense<0.000000e+00> : vector<8x128xf32>
    %28 = tpu.matmul %26, %27, %cst_18 {dimension_numbers = #tpu.dot_dimension_numbers<[1], [0], [0], [1], [0, 0, 1, 1], [], []>} : vector<8x128xf32>, vector<128x128xf32>, vector<8x128xf32> -> vector<8x128xf32>
    %c0_19 = arith.constant 0 : index
    %c0_20 = arith.constant 0 : index
    %29 = vector.load %arg7[%c0_19, %c0_20] : memref<1x128xf32, #tpu.memory_space<vmem>>, vector<1x128xf32>
    %30 = vector.broadcast %29 : vector<1x128xf32> to vector<8x128xf32>
    %31 = arith.addf %28, %30 : vector<8x128xf32>
    %cst_21 = arith.constant dense<0xFF800000> : vector<8xf32>
    %32 = vector.multi_reduction <maximumf>, %31, %cst_21 [1] : vector<8x128xf32> to vector<8xf32>
    %33 = vector.shape_cast %32 : vector<8xf32> to vector<8x1xf32>
    %34 = vector.broadcast %33 : vector<8x1xf32> to vector<8x128xf32>
    %35 = arith.subf %31, %34 : vector<8x128xf32>
    %36 = math.exp %35 : vector<8x128xf32>
    %cst_22 = arith.constant dense<0.000000e+00> : vector<8xf32>
    %37 = vector.multi_reduction <add>, %36, %cst_22 [1] : vector<8x128xf32> to vector<8xf32>
    %38 = vector.shape_cast %37 : vector<8xf32> to vector<8x1xf32>
    %39 = tpu.reciprocal %38 : vector<8x1xf32> -> vector<8x1xf32>
    %40 = vector.broadcast %39 : vector<8x1xf32> to vector<8x128xf32>
    %41 = arith.mulf %36, %40 : vector<8x128xf32>
    %c0_23 = arith.constant 0 : index
    %c0_24 = arith.constant 0 : index
    %42 = vector.load %arg8[%c0_23, %c0_24] : memref<8x128xf32, #tpu.memory_space<vmem>>, vector<8x128xf32>
    tpu.vector_store %arg8[%c0_23, %c0_24], %41 {strides = array<i32>} : memref<8x128xf32, #tpu.memory_space<vmem>>, vector<8x128xf32>,
    return
  }
  func.func @transform_0(%arg0: i32) -> (i32, i32) {
    %c0_i32 = arith.constant 0 : i32
    %c0_i32_0 = arith.constant 0 : i32
    return %arg0, %c0_i32 : i32, i32
  }
  func.func @transform_1(%arg0: i32) -> (i32, i32) {
    %c0_i32 = arith.constant 0 : i32
    %c0_i32_0 = arith.constant 0 : i32
    %c0_i32_1 = arith.constant 0 : i32
    return %c0_i32, %c0_i32_0 : i32, i32
  }
  func.func @transform_2(%arg0: i32) -> (i32, i32) {
    %c0_i32 = arith.constant 0 : i32
    %c0_i32_0 = arith.constant 0 : i32
    %c0_i32_1 = arith.constant 0 : i32
    return %c0_i32, %c0_i32_0 : i32, i32
  }
  func.func @transform_3(%arg0: i32) -> (i32, i32) {
    %c0_i32 = arith.constant 0 : i32
    %c0_i32_0 = arith.constant 0 : i32
    %c0_i32_1 = arith.constant 0 : i32
    return %c0_i32, %c0_i32_0 : i32, i32
  }
  func.func @transform_4(%arg0: i32) -> (i32, i32) {
    %c0_i32 = arith.constant 0 : i32
    %c0_i32_0 = arith.constant 0 : i32
    %c0_i32_1 = arith.constant 0 : i32
    return %c0_i32, %c0_i32_0 : i32, i32
  }
  func.func @transform_5(%arg0: i32) -> (i32, i32) {
    %c0_i32 = arith.constant 0 : i32
    %c0_i32_0 = arith.constant 0 : i32
    %c0_i32_1 = arith.constant 0 : i32
    return %c0_i32, %c0_i32_0 : i32, i32
  }
  func.func @transform_6(%arg0: i32) -> (i32, i32) {
    %c0_i32 = arith.constant 0 : i32
    %c0_i32_0 = arith.constant 0 : i32
    %c0_i32_1 = arith.constant 0 : i32
    return %c0_i32, %c0_i32_0 : i32, i32
  }
  func.func @transform_7(%arg0: i32) -> (i32, i32) {
    %c0_i32 = arith.constant 0 : i32
    %c0_i32_0 = arith.constant 0 : i32
    return %arg0, %c0_i32 : i32, i32
  }
}

</mosaic_0001>

<bundles_post_ra>
// kernel: mlp_policy_forward.1
= control target key start
LH: loop header
LB: loop body
LE: loop exit
PB: predicated region body
PF: predicated region fallthrough
CT: control target
= control target key end

     0   :  { %12 = vsyncpa [#allocation3], 0  ;;  %s551_s0 = inlined_call_operand.hbm [shape: f32[6,32], index: 0, kind: input, shape index: {}]   ;;  %s552_s1 = inlined_call_operand.hbm [shape: f32[32,128], index: 1, kind: input, shape index: {}]   ;;  %s553_s2 = inlined_call_operand.vmem [shape: f32[1,128], index: 2, kind: input, shape index: {}]   ;;  %s554_s3 = inlined_call_operand.hbm [shape: f32[128,128], index: 3, kind: input, shape index: {}]   ;;  %s555_s4 = inlined_call_operand.vmem [shape: f32[1,128], index: 4, kind: input, shape index: {}]   ;;  %s556_s5 = inlined_call_operand.hbm [shape: f32[128,128], index: 5, kind: input, shape index: {}]   ;;  %s557_s6 = inlined_call_operand.vmem [shape: f32[1,128], index: 6, kind: input, shape index: {}]   ;;  %s558_s7 = inlined_call_operand.hbm [shape: f32[6,128], index: 7, kind: output, shape index: {}]  }
   0x1   :  { %13 = vsyncpa [#allocation6], 0 }
   0x2   :  { %14 = vsyncpa [#allocation9], 0  ;;  %s31_s26 = sshll.u32 %s552_s1, 4  ;;  %s32_s26 = int_to_ptr.hbm [resolvable:$true] %s31_s26 }
   0x3   :  { %15 = vsyncpa [#allocation4], 0  ;;  %s480_s27 = smov [#allocation5]   ;;  %s21_s8 = sshll.u32 %s551_s0, 4  ;;  %s22_s8 = int_to_ptr.hbm [resolvable:$true] %s21_s8 }
   0x4   :  { %s33_s28 = sshll.u32 %s480_s27, 4  ;;  %s481_s9 = smov 128   ;;  %s34_s28 = int_to_ptr.vmem [resolvable:$true] %s33_s28 }
   0x5   :  { %s482_s10 = smov 8   ;;  %s483_s11 = smov [#allocation2]  }
   0x6   :  { %39 = dma.hbm_to_vmem [thread:$0]  %s32_s26, 512, %s34_s28, [#allocation6], %s481_s9, %s481_s9, %s482_s10  }
   0x7   :  { %s23_s12 = sshll.u32 %s483_s11, 4  ;;  %s46_s15 = sshll.u32 %s554_s3, 4  ;;  %s24_s12 = int_to_ptr.vmem [resolvable:$true] %s23_s12  ;;  %s47_s15 = int_to_ptr.hbm [resolvable:$true] %s46_s15 }
   0x8   :  { %26 = dma.hbm_to_vmem [thread:$0]  %s22_s8, 128, %s24_s12, [#allocation3]  }
   0x9   :  { %s61_s17 = sshll.u32 %s556_s5, 4  ;;  %s484_s18 = smov [#allocation7]   ;;  %s62_s17 = int_to_ptr.hbm [resolvable:$true] %s61_s17 }
   0xa   :  { %s48_s19 = sshll.u32 %s484_s18, 4  ;;  %s485_s0 = smov [#allocation8]   ;;  %s49_s19 = int_to_ptr.vmem [resolvable:$true] %s48_s19 }
   0xb   :  { %54 = dma.hbm_to_vmem [thread:$0]  %s47_s15, 2048, %s49_s19, [#allocation6], %s481_s9, %s481_s9, %s482_s10  }
   0xc   :  { %s63_s20 = sshll.u32 %s485_s0, 4  ;;  %s64_s20 = int_to_ptr.vmem [resolvable:$true] %s63_s20 }
   0xd   :  { %69 = dma.hbm_to_vmem [thread:$0]  %s62_s17, 2048, %s64_s20, [#allocation9], %s481_s9, %s481_s9, %s482_s10  }
   0xe   :  { %472 = dma.done.wait [#allocation3], 128  }
   0xf   :  { %473 = vsyncadd [#allocation3], 4294967168 }
  0x10   :  { %474 = dma.done.wait [#allocation6], 2560  }
  0x11   :  { %475 = vsyncadd [#allocation6], 4294964736 }
  0x12   :  { %476 = dma.done.wait [#allocation9], 2048  }
  0x13   :  { %477 = vsyncadd [#allocation9], 4294965248  ;;  %v92_v0 = vld [vmem:[#allocation5 + $0x18] sm:$0xff]  ;;  %v91_v1 = vld [vmem:[#allocation5 + $0x10] sm:$0xff]  ;;  %vm97_vm0 = vcmask 261120   ;;  %s319_s26 = sshll.u32 %s558_s7, 4  ;;  %s320_s26 = int_to_ptr.hbm [resolvable:$true] %s319_s26 }
  0x14   :  { %113 = vmatpush.msra.mxu0 %v92_v0  ;;  %v90_v2 = vld [vmem:[#allocation5 + $0x8] sm:$0xff]  ;;  %v89_v3 = vld [vmem:[#allocation5] sm:$0xff]  ;;  %v88_v4 = vld [vmem:[#allocation2] sm:$0xff] }
  0x15   :  { %v180_v5 = vld [vmem:[#allocation7 + $0x78] sm:$0xff]  ;;  %v179_v6 = vld [vmem:[#allocation7 + $0x70] sm:$0xff]  ;;  %v178_v7 = vld [vmem:[#allocation7 + $0x68] sm:$0xff] }
  0x16   :  { %114 = vmatpush.msra.mxu0 %v91_v1  ;;  %185 = vmatpush.msra.mxu1 %v180_v5  ;;  %v177_v8 = vld [vmem:[#allocation7 + $0x60] sm:$0xff]  ;;  %v341_v9 = vld [vmem:[%s553_s2] ss:$0 sm:$0xff]  ;;  %v175_v11 = vld [vmem:[#allocation7 + $0x50] sm:$0xff] }
  0x17   :  { %v176_v10 = vld [vmem:[#allocation7 + $0x58] sm:$0xff]  ;;  %v174_v13 = vld [vmem:[#allocation7 + $0x48] sm:$0xff]  ;;  %v173_v15 = vld [vmem:[#allocation7 + $0x40] sm:$0xff] }
  0x18   :  { %115 = vmatpush.msra.mxu0 %v90_v2  ;;  %186 = vmatpush.msra.mxu1 %v179_v6  ;;  %v172_v17 = vld [vmem:[#allocation7 + $0x38] sm:$0xff]  ;;  %v171_v19 = vld [vmem:[#allocation7 + $0x30] sm:$0xff]  ;;  %v170_v21 = vld [vmem:[#allocation7 + $0x28] sm:$0xff] }
  0x19   :  { %v169_v24 = vld [vmem:[#allocation7 + $0x20] sm:$0xff]  ;;  %v168_v27 = vld [vmem:[#allocation7 + $0x18] sm:$0xff]  ;;  %v167_v30 = vld [vmem:[#allocation7 + $0x10] sm:$0xff] }
  0x1a   :  { %116 = vmatpush.msra.mxu0 %v89_v3  ;;  %187 = vmatpush.msra.mxu1 %v178_v7  ;;  %v166_v33 = vld [vmem:[#allocation7 + $0x8] sm:$0xff]  ;;  %v165_v35 = vld [vmem:[#allocation7] sm:$0xff]  ;;  %v264_v63 = vld [vmem:[#allocation8 + $0x78] sm:$0xff] }
  0x1b   :  { %331 = vmatmul.msk.f32.vlgmr.msra.gmra.mxu0 %vm97_vm0, %v88_v4  ;;  %269 = vmatpush.msra.mxu2 %v264_v63  ;;  %v263_v0 = vld [vmem:[#allocation8 + $0x70] sm:$0xff]  ;;  %v262_v1 = vld [vmem:[#allocation8 + $0x68] sm:$0xff]  ;;  %v342_v2 = vld [vmem:[%s555_s4] ss:$0 sm:$0xff] }
  0x1c   :  { %188 = vmatpush.msra.mxu1 %v177_v8  ;;  %v261_v3 = vld [vmem:[#allocation8 + $0x60] sm:$0xff]  ;;  %v260_v4 = vld [vmem:[#allocation8 + $0x58] sm:$0xff]  ;;  %v259_v5 = vld [vmem:[#allocation8 + $0x50] sm:$0xff] }
  0x1d   :  { %270 = vmatpush.msra.mxu2 %v263_v0  ;;  %v258_v8 = vld [vmem:[#allocation8 + $0x48] sm:$0xff] }
  0x1e   :  { %189 = vmatpush.msra.mxu1 %v176_v10  ;;  %v257_v10 = vld [vmem:[#allocation8 + $0x40] sm:$0xff] }
  0x1f   :  { %271 = vmatpush.msra.mxu2 %v262_v1 }
  0x20   :  { %190 = vmatpush.msra.mxu1 %v175_v11 }
  0x21   :  { %272 = vmatpush.msra.mxu2 %v261_v3 }
  0x22   :  { %191 = vmatpush.msra.mxu1 %v174_v13 }
  0x23   :  { %273 = vmatpush.msra.mxu2 %v260_v4 }
  0x24   :  { %192 = vmatpush.msra.mxu1 %v173_v15 }
  0x25   :  { %274 = vmatpush.msra.mxu2 %v259_v5 }
  0x26   :  { %193 = vmatpush.msra.mxu1 %v172_v17 }
  0x27   :  { %275 = vmatpush.msra.mxu2 %v258_v8 }
  0x28   :  { %194 = vmatpush.msra.mxu1 %v171_v19  ;;  %v253_v19 = vld [vmem:[#allocation8 + $0x20] sm:$0xff] }
  0x29   :  { %276 = vmatpush.msra.mxu2 %v257_v10 }
  0x2a   :  { %195 = vmatpush.msra.mxu1 %v170_v21 }
  0x2c   :  { %196 = vmatpush.msra.mxu1 %v169_v24  ;;  %v251_v24 = vld [vmem:[#allocation8 + $0x10] sm:$0xff] }
  0x2e   :  { %197 = vmatpush.msra.mxu1 %v168_v27  ;;  %v250_v27 = vld [vmem:[#allocation8 + $0x8] sm:$0xff] }
  0x30   :  { %198 = vmatpush.msra.mxu1 %v167_v30 }
  0x32   :  { %199 = vmatpush.msra.mxu1 %v166_v33 }
  0x34   :  { %200 = vmatpush.msra.mxu1 %v165_v35 }
  0x98   :  { %v118_v12 = vpop.f32.mrf.mxu0 }
  0x99   :  { %v119_v14 = vadd.f32 %v341_v9, %v118_v12  ;;  %v256_v12 = vld [vmem:[#allocation8 + $0x38] sm:$0xff] }
  0x9a   :  { %277 = vmatpush.msra.mxu2 %v256_v12 }
  0x9b   :  { %v122_v16 = vmul.f32 0.70710677, %v119_v14  ;;  %v121_v60 = vmul.f32 0.5, %v119_v14  ;;  %v255_v14 = vld [vmem:[#allocation8 + $0x30] sm:$0xff] }
  0x9c   :  { %278 = vmatpush.msra.mxu2 %v255_v14 }
  0x9d   :  { %v123_v18 = vmul.f32 %v122_v16, %v122_v16 }
  0x9f   :  { %v124_v20 = vmin.f32 %v123_v18, 16.0 }
  0xa1   :  { %v125_v22 = vmul.f32 2.1237322e-06, %v124_v20  ;;  %v136_v23 = vmul.f32 3.8918573e-05, %v124_v20 }
  0xa3   :  { %v126_v25 = vadd.f32 0.00028619796, %v125_v22  ;;  %v137_v26 = vadd.f32 0.001143296, %v136_v23  ;;  %v252_v22 = vld [vmem:[#allocation8 + $0x18] sm:$0xff] }
  0xa5   :  { %v127_v28 = vmul.f32 %v126_v25, %v124_v20  ;;  %v138_v29 = vmul.f32 %v137_v26, %v124_v20 }
  0xa7   :  { %v139_v31 = vadd.f32 0.014752088, %v138_v29  ;;  %v128_v32 = vadd.f32 0.0036580483, %v127_v28  ;;  %v249_v29 = vld [vmem:[#allocation8] sm:$0xff] }
  0xa9   :  { %v140_v34 = vmul.f32 %v139_v31, %v124_v20  ;;  %v129_v37 = vmul.f32 %v128_v32, %v124_v20 }
  0xab   :  { %v141_v36 = vadd.f32 0.112945676, %v140_v34  ;;  %v130_v40 = vadd.f32 0.05243302, %v129_v37 }
  0xad   :  { %v142_v38 = vmul.f32 %v141_v36, %v124_v20  ;;  %v131_v43 = vmul.f32 %v130_v40, %v124_v20 }
  0xaf   :  { %v143_v39 = vadd.f32 0.4994258, %v142_v38  ;;  %v132_v44 = vadd.f32 0.18741608, %v131_v43 }
  0xb1   :  { %v144_v41 = vmul.f32 %v143_v39, %v124_v20  ;;  %v133_v46 = vmul.f32 %v132_v44, %v124_v20 }
  0xb3   :  { %v145_v42 = vadd.f32 1.0, %v144_v41  ;;  %v134_v50 = vadd.f32 1.1283791, %v133_v46 }
  0xb5   :  { %344 = vrcp.f32 %v145_v42  ;;  %v157_v49 = vand.u32 2147483648, %v145_v42  ;;  %v155_v52 = vand.u32 2147483647, %v145_v42  ;;  %vm151_vm2 = vweird.f32 %v145_v42 }
  0xb6   :  { %v135_v55 = vmul.f32 %v134_v50, %v122_v16  ;;  %v254_v16 = vld [vmem:[#allocation8 + $0x28] sm:$0xff] }
  0xb7   :  { %v158_v54 = vor.u32 1.1754944e-38, %v157_v49  ;;  %vm156_vm4 = vcmp.eq.f32.partialorder %v155_v52, 8.507059e+37  ;;  %279 = vmatpush.msra.mxu2 %v254_v16 }
  0xb9   :  { %280 = vmatpush.msra.mxu2 %v253_v19 }
  0xbb   :  { %v345_v45 = vpop.eup %344  ;;  %281 = vmatpush.msra.mxu2 %v252_v22 }
  0xbc   :  { %v147_v47 = vmul.f32 %v345_v45, %v145_v42  ;;  %vm152_vm1 = vweird.f32 %v345_v45 }
  0xbd   :  { %vm153_vm3 = vmor %vm151_vm2, %vm152_vm1  ;;  %282 = vmatpush.msra.mxu2 %v251_v24 }
  0xbe   :  { %v148_v48 = vsub.f32 1.0, %v147_v47 }
  0xbf   :  { %283 = vmatpush.msra.mxu2 %v250_v27 }
  0xc0   :  { %v149_v51 = vmul.f32 %v345_v45, %v148_v48 }
  0xc1   :  { %284 = vmatpush.msra.mxu2 %v249_v29 }
  0xc2   :  { %v150_v53 = vadd.f32 %v345_v45, %v149_v51 }
  0xc4   :  { %v154_v56 = vsel %vm153_vm3, %v345_v45, %v150_v53 }
  0xc5   :  { %v159_v57 = vsel %vm156_vm4, %v158_v54, %v154_v56 }
  0xc6   :  { %v160_v58 = vmul.f32 %v159_v57, %v135_v55  ;;  %v343_v57 = vld [vmem:[%s557_s6] ss:$0 sm:$0xff]  ;;  %s486_s6 = smov [#allocation10]  }
  0xc7   :  { %s317_s23 = sshll.u32 %s486_s6, 4  ;;  %s318_s23 = int_to_ptr.vmem [resolvable:$true] %s317_s23 }
  0xc8   :  { %v332_v59 = vclamps-f32 %v160_v58, 1.0 }
  0xca   :  { %v163_v61 = vadd.f32 1.0, %v332_v59 }
  0xcc   :  { %v164_v62 = vmul.f32 %v163_v61, %v121_v60 }
  0xce   :  { %201 = vmatmul.f32.vlgmr.msra.gmra.mxu1 %v164_v62 }
 0x14b   :  { %v202_v6 = vpop.f32.mrf.mxu1 }
 0x14c   :  { %v203_v7 = vadd.f32 %v342_v2, %v202_v6 }
 0x14e   :  { %v206_v9 = vmul.f32 0.70710677, %v203_v7  ;;  %v205_v54 = vmul.f32 0.5, %v203_v7 }
 0x150   :  { %v207_v11 = vmul.f32 %v206_v9, %v206_v9 }
 0x152   :  { %v208_v13 = vmin.f32 %v207_v11, 16.0 }
 0x154   :  { %v209_v15 = vmul.f32 2.1237322e-06, %v208_v13  ;;  %v220_v17 = vmul.f32 3.8918573e-05, %v208_v13 }
 0x156   :  { %v210_v18 = vadd.f32 0.00028619796, %v209_v15  ;;  %v221_v20 = vadd.f32 0.001143296, %v220_v17 }
 0x158   :  { %v211_v21 = vmul.f32 %v210_v18, %v208_v13  ;;  %v222_v23 = vmul.f32 %v221_v20, %v208_v13 }
 0x15a   :  { %v223_v25 = vadd.f32 0.014752088, %v222_v23  ;;  %v212_v26 = vadd.f32 0.0036580483, %v211_v21 }
 0x15c   :  { %v224_v28 = vmul.f32 %v223_v25, %v208_v13  ;;  %v213_v31 = vmul.f32 %v212_v26, %v208_v13 }
 0x15e   :  { %v225_v30 = vadd.f32 0.112945676, %v224_v28  ;;  %v214_v34 = vadd.f32 0.05243302, %v213_v31 }
 0x160   :  { %v226_v32 = vmul.f32 %v225_v30, %v208_v13  ;;  %v215_v37 = vmul.f32 %v214_v34, %v208_v13 }
 0x162   :  { %v227_v33 = vadd.f32 0.4994258, %v226_v32  ;;  %v216_v38 = vadd.f32 0.18741608, %v215_v37 }
 0x164   :  { %v228_v35 = vmul.f32 %v227_v33, %v208_v13  ;;  %v217_v40 = vmul.f32 %v216_v38, %v208_v13 }
 0x166   :  { %v229_v36 = vadd.f32 1.0, %v228_v35  ;;  %v218_v44 = vadd.f32 1.1283791, %v217_v40 }
 0x168   :  { %346 = vrcp.f32 %v229_v36  ;;  %v241_v43 = vand.u32 2147483648, %v229_v36  ;;  %v239_v46 = vand.u32 2147483647, %v229_v36  ;;  %vm235_vm6 = vweird.f32 %v229_v36 }
 0x169   :  { %v219_v49 = vmul.f32 %v218_v44, %v206_v9 }
 0x16a   :  { %v242_v48 = vor.u32 1.1754944e-38, %v241_v43  ;;  %vm240_vm8 = vcmp.eq.f32.partialorder %v239_v46, 8.507059e+37 }
 0x16e   :  { %v347_v39 = vpop.eup %346 }
 0x16f   :  { %v231_v41 = vmul.f32 %v347_v39, %v229_v36  ;;  %vm236_vm5 = vweird.f32 %v347_v39 }
 0x170   :  { %vm237_vm7 = vmor %vm235_vm6, %vm236_vm5 }
 0x171   :  { %v232_v42 = vsub.f32 1.0, %v231_v41 }
 0x173   :  { %v233_v45 = vmul.f32 %v347_v39, %v232_v42 }
 0x175   :  { %v234_v47 = vadd.f32 %v347_v39, %v233_v45 }
 0x177   :  { %v238_v50 = vsel %vm237_vm7, %v347_v39, %v234_v47 }
 0x178   :  { %v243_v51 = vsel %vm240_vm8, %v242_v48, %v238_v50 }
 0x179   :  { %v244_v52 = vmul.f32 %v243_v51, %v219_v49 }
 0x17b   :  { %v333_v53 = vclamps-f32 %v244_v52, 1.0 }
 0x17d   :  { %v247_v55 = vadd.f32 1.0, %v333_v53 }
 0x17f   :  { %v248_v56 = vmul.f32 %v247_v55, %v205_v54 }
 0x181   :  { %285 = vmatmul.f32.vlgmr.msra.gmra.mxu2 %v248_v56 }
 0x204   :  { %v286_v58 = vpop.f32.mrf.mxu2 }
 0x205   :  { %v287_v59 = vadd.f32 %v343_v57, %v286_v58 }
 0x207   :  { %289 = vmax.xlane.f32.xlu0 %v287_v59 }
 0x27a   :  { %v290_v60 = vpop.xlane.xlu0 %289 }
 0x27b   :  { %v291_v61 = vsub.f32 %v287_v59, %v290_v60 }
 0x27d   :  { %v292_v62 = vmul.f32 1.442695, %v291_v61 }
 0x27f   :  { %348 = vpow2.f32 %v292_v62 }
 0x285   :  { %v349_v63 = vpop.eup %348 }
 0x286   :  { %294 = vadd.xlane.f32.xlu0 %v349_v63 }
 0x2f9   :  { %v295_v0 = vpop.xlane.xlu0 %294 }
 0x2fa   :  { %350 = vrcp.f32 %v295_v0  ;;  %v307_v4 = vand.u32 2147483648, %v295_v0  ;;  %v305_v6 = vand.u32 2147483647, %v295_v0  ;;  %vm301_vm10 = vweird.f32 %v295_v0 }
 0x2fc   :  { %v308_v8 = vor.u32 1.1754944e-38, %v307_v4  ;;  %vm306_vm12 = vcmp.eq.f32.partialorder %v305_v6, 8.507059e+37 }
 0x300   :  { %v351_v1 = vpop.eup %350 }
 0x301   :  { %v297_v2 = vmul.f32 %v351_v1, %v295_v0  ;;  %vm302_vm9 = vweird.f32 %v351_v1 }
 0x302   :  { %vm303_vm11 = vmor %vm301_vm10, %vm302_vm9 }
 0x303   :  { %v298_v3 = vsub.f32 1.0, %v297_v2 }
 0x305   :  { %v299_v5 = vmul.f32 %v351_v1, %v298_v3 }
 0x307   :  { %v300_v7 = vadd.f32 %v351_v1, %v299_v5 }
 0x309   :  { %v304_v9 = vsel %vm303_vm11, %v351_v1, %v300_v7 }
 0x30a   :  { %v309_v10 = vsel %vm306_vm12, %v308_v8, %v304_v9 }
 0x30b   :  { %v310_v11 = vmul.f32 %v349_v63, %v309_v10 }
 0x30d   :  { %311 = vst [vmem:[#allocation10] sm:$0xff] %v310_v11 }
 0x30e   :  { %322 = dma.vmem_to_hbm [thread:$0]  %s318_s23, 128, %s320_s26, [#allocation4]  }
 0x30f   :  { %478 = dma.done.wait [#allocation4], 128  }
 0x310   :  { %479 = vsyncadd [#allocation4], 4294967168 }
 0x311   :  { %327 = vsyncpa [#allocation3], 1 }
 0x312   :  { %328 = vsyncpa [#allocation6], 1 }
 0x313   :  { %329 = vsyncpa [#allocation9], 1 }
 0x314   :  { %330 = vsyncpa [#allocation4], 1 }

</bundles_post_ra>
